<compile_context>
chip_gen: v6e
topology: v6e:2x2x1
jax: 0.10.0
libtpu: 0.0.40
codegen_flags: <defaults>
</compile_context>

<pallas_src>
import functools
import math

import jax
import jax.numpy as jnp
from jax import lax
from jax.experimental import pallas as pl
from jax.experimental.pallas import tpu as pltpu


_DEF_VMEM_CAP = 64 * 1024 * 1024  # conservative default = v7x physical VMEM per TC


def _tpu_caps():
    """(physical VMEM bytes per core, TensorCore count). Safe fallbacks."""
    vmem = _DEF_VMEM_CAP
    cores = 1
    try:
        info = pltpu.get_tpu_info()
        vmem = int(getattr(info, "vmem_capacity_bytes", vmem))
        for attr in ("num_cores", "core_count", "tensorcore_count", "num_tensorcores"):
            v = getattr(info, attr, None)
            if v:
                cores = int(v)
                break
    except Exception:
        pass
    return vmem, max(1, cores)


def _choose_tiles(n_rows, dl, *, vmem_limit, pipelined_bytes_per_elem,
                  block_bytes_per_elem, target_block_bytes, sublane=32):
    """Pick (row_tile, col_tile): VMEM-budget bound, lane-dense, 32-row aligned."""
    budget = (vmem_limit * 7) // 10          # headroom for params/partials/temps

    # Feature-axis fallback: only when even a minimal (32-row) full-width block
    # would blow the budget (very large D).  Col tiles are multiples of 128.
    col_tile = dl
    min_rows = min(n_rows, sublane)
    if dl > 128 and min_rows * dl * pipelined_bytes_per_elem > budget:
        col_tile = (budget // (min_rows * pipelined_bytes_per_elem) // 128) * 128
        col_tile = int(max(128, min(col_tile, dl)))

    by_vmem = budget // max(col_tile * pipelined_bytes_per_elem, 1)
    by_target = target_block_bytes // max(col_tile * block_bytes_per_elem, 1)
    rt = int(min(by_vmem, by_target))
    if rt >= n_rows:
        return int(n_rows), int(col_tile)
    rt = max(sublane, (rt // sublane) * sublane)
    return int(rt), int(col_tile)


# ----------------------------------------------------------------------------
# Kernel 1: shifted sum / sum-of-squares over rows.
#   grid = (n_split, col_blocks, tiles_per_split); ("parallel","arbitrary","arbitrary").
#   Each (split, col-block) accumulates (8, col_tile) per-sublane partials
#   directly in its resident output block; the cheap cross-sublane /
#   cross-split combine happens in the JAX glue on [Dl]-sized arrays.
# ----------------------------------------------------------------------------
def _stats_kernel(x_ref, shift_ref, sum_ref, sq_ref, *,
                  n_rows, row_tile, tiles_per_split, may_need_mask):
    s = pl.program_id(0)
    t = pl.program_id(2)

    @pl.when(t == 0)
    def _():
        sum_ref[...] = jnp.zeros_like(sum_ref)
        sq_ref[...] = jnp.zeros_like(sq_ref)

    xb = x_ref[...].astype(jnp.float32) - shift_ref[...]

    def accumulate(v):
        if row_tile % 8 == 0:
            # Per-sublane partials: pure VALU adds; XLU reduce deferred to glue.
            sum_ref[...] += jnp.sum(v.reshape(row_tile // 8, 8, -1), axis=0)
            sq_ref[...] += jnp.sum((v * v).reshape(row_tile // 8, 8, -1), axis=0)
        else:
            # Tiny single-tile case (row_tile == n_rows, not a multiple of 8).
            sum_ref[0:1, :] = sum_ref[0:1, :] + jnp.sum(v, axis=0, keepdims=True)
            sq_ref[0:1, :] = sq_ref[0:1, :] + jnp.sum(v * v, axis=0, keepdims=True)

    if may_need_mask:
        blk = s * tiles_per_split + t
        is_full = (blk + 1) * row_tile <= n_rows

        @pl.when(is_full)
        def _():
            accumulate(xb)                    # unmasked fast path

        @pl.when(jnp.logical_not(is_full))
        def _():                              # ragged / over-covered tail only
            rows = lax.broadcasted_iota(jnp.int32, xb.shape, 0)
            accumulate(jnp.where(rows < (n_rows - blk * row_tile), xb, 0.0))
    else:
        accumulate(xb)


def batch_stats_sums(x2d, shift_row, *, row_tile, col_tile, n_split, vmem_limit):
    """x2d: [N_rows, Dl] (native dtype); shift_row: [1, Dl] f32.

    Returns per-split per-sublane partial sums of (x - shift) and (x - shift)^2,
    each [n_split*8, Dl] f32 (combine + normalize in the caller)."""
    n, dl = x2d.shape
    n_row_blocks = pl.cdiv(n, row_tile)
    n_col_blocks = pl.cdiv(dl, col_tile)
    n_split = max(1, min(n_split, n_row_blocks))     # shard across TCs when possible
    tiles_per_split = pl.cdiv(n_row_blocks, n_split)
    may_need_mask = (n_split * tiles_per_split * row_tile) != n

    kernel = functools.partial(
        _stats_kernel, n_rows=n, row_tile=row_tile,
        tiles_per_split=tiles_per_split, may_need_mask=may_need_mask)

    def x_map(s, dj, t):
        return (jnp.minimum(s * tiles_per_split + t, n_row_blocks - 1), dj)

    out_sd = jax.ShapeDtypeStruct((n_split * 8, dl), jnp.float32)
    sum8, sq8 = pl.pallas_call(
        kernel,
        out_shape=(out_sd, out_sd),
        grid_spec=pltpu.PrefetchScalarGridSpec(
            num_scalar_prefetch=0,
            grid=(n_split, n_col_blocks, tiles_per_split),
            in_specs=[
                pl.BlockSpec((row_tile, col_tile), x_map),
                pl.BlockSpec((1, col_tile), lambda s, dj, t: (0, dj)),
            ],
            out_specs=[
                pl.BlockSpec((8, col_tile), lambda s, dj, t: (s, dj)),
                pl.BlockSpec((8, col_tile), lambda s, dj, t: (s, dj)),
            ],
        ),
        compiler_params=pltpu.CompilerParams(
            dimension_semantics=("parallel", "arbitrary", "arbitrary"),
            vmem_limit_bytes=int(vmem_limit),
        ),
    )(x2d, shift_row)
    return sum8, sq8


# ----------------------------------------------------------------------------
# Kernel 2: elementwise affine-normalization:
#   out = (x - mu) * scale + beta   with scale = sigmoid(rho) / (sigma + eps).
# ----------------------------------------------------------------------------
def _norm_kernel(x_ref, mu_ref, scale_ref, beta_ref, o_ref):
    x = x_ref[...].astype(jnp.float32)
    o_ref[...] = ((x - mu_ref[...]) * scale_ref[...] + beta_ref[...]).astype(o_ref.dtype)


def affine_norm(x2d, mu_row, scale_row, beta_row, *, row_tile, col_tile,
                vmem_limit, out_dtype):
    n, dl = x2d.shape
    param_spec = pl.BlockSpec((1, col_tile), lambda i, j: (0, j))
    return pl.pallas_call(
        _norm_kernel,
        out_shape=jax.ShapeDtypeStruct((n, dl), out_dtype),
        grid_spec=pltpu.PrefetchScalarGridSpec(
            num_scalar_prefetch=0,
            grid=(pl.cdiv(n, row_tile), pl.cdiv(dl, col_tile)),
            in_specs=[
                pl.BlockSpec((row_tile, col_tile), lambda i, j: (i, j)),
                param_spec,   # mu
                param_spec,   # scale
                param_spec,   # beta
            ],
            out_specs=pl.BlockSpec((row_tile, col_tile), lambda i, j: (i, j)),
        ),
        compiler_params=pltpu.CompilerParams(
            dimension_semantics=("parallel", "parallel"),
            vmem_limit_bytes=int(vmem_limit),
        ),
    )(x2d, mu_row, scale_row, beta_row)


# ----------------------------------------------------------------------------
# Module-level wrapper mirroring BatchAffineNorm.forward.
# ----------------------------------------------------------------------------
def batch_affine_norm_forward(x, mu, sigma, rho, beta, steps,
                              *, eps=1e-6, momentum=0.002, training=True):
    """x: [B, T, D]. Returns (out, new_mu, new_sigma, new_steps).

    Buffer updates are returned functionally (PyTorch mutates them in place);
    normalization uses the *updated* buffers, matching the module."""
    b, t, d = x.shape
    n = b * t
    in_itemsize = jnp.dtype(x.dtype).itemsize
    out_dtype = x.dtype
    out_itemsize = jnp.dtype(out_dtype).itemsize

    # Fold rows into lanes so k*D is a multiple of 128 (lane-dense loads/stores).
    k = 128 // math.gcd(d, 128)
    if k > 1 and (n % k != 0 or k * d > 65536):
        k = 1
    dl = k * d
    n_rows = n // k
    x2d = x.reshape(n_rows, dl)

    def tile_param(p):
        p = jnp.asarray(p, jnp.float32).reshape(1, d)
        return jnp.tile(p, (1, k)) if k > 1 else p

    vmem_cap, cores = _tpu_caps()
    vmem_limit = (vmem_cap * 3) // 4                         # ~25% headroom
    target_block = max(2 << 20, min(16 << 20, vmem_limit // 8))  # gen-aware block size

    mu32 = jnp.asarray(mu, jnp.float32)
    sigma32 = jnp.asarray(sigma, jnp.float32)

    if training:
        rt_stats, ct_stats = _choose_tiles(
            n_rows, dl, vmem_limit=vmem_limit,
            pipelined_bytes_per_elem=2 * in_itemsize + 8,
            block_bytes_per_elem=in_itemsize,
            target_block_bytes=target_block)
        # Shifted (around the running mean) one-pass moments: mitigates
        # E[x^2] - E[x]^2 cancellation when |mean| >> std.
        sum8, sq8 = batch_stats_sums(
            x2d, tile_param(mu32), row_tile=rt_stats, col_tile=ct_stats,
            n_split=cores, vmem_limit=vmem_limit)
        s1 = jnp.sum(sum8, axis=0)
        s2 = jnp.sum(sq8, axis=0)
        if k > 1:
            s1 = jnp.sum(s1.reshape(k, d), axis=0)
            s2 = jnp.sum(s2.reshape(k, d), axis=0)
        inv_n = jnp.float32(1.0 / n)
        m1 = s1 * inv_n
        mean = mu32 + m1
        var = jnp.maximum(s2 * inv_n - m1 * m1, 0.0)   # biased (unbiased=False)
        std = jnp.sqrt(var)
        new_mu = (1.0 - momentum) * mu32 + momentum * mean
        new_sigma = (1.0 - momentum) * sigma32 + momentum * std
        new_steps = steps + 1
    else:
        new_mu, new_sigma, new_steps = mu32, sigma32, steps

    gamma = jax.nn.sigmoid(jnp.asarray(rho, jnp.float32))
    scale = gamma / (new_sigma + eps)

    rt_norm, ct_norm = _choose_tiles(
        n_rows, dl, vmem_limit=vmem_limit,
        pipelined_bytes_per_elem=2 * in_itemsize + 2 * out_itemsize + 4,
        block_bytes_per_elem=in_itemsize,
        target_block_bytes=target_block)
    # Give each TensorCore at least one block on multi-core parts (v7x).
    if cores >= 2 and n_rows >= cores * 32:
        per_core = pl.cdiv(n_rows, cores)
        if rt_norm > per_core:
            rt_norm = max(32, (per_core // 32) * 32)

    out2d = affine_norm(x2d, tile_param(new_mu), tile_param(scale),
                        tile_param(jnp.asarray(beta, jnp.float32)),
                        row_tile=rt_norm, col_tile=ct_norm,
                        vmem_limit=vmem_limit, out_dtype=out_dtype)
    return out2d.reshape(b, t, d), new_mu, new_sigma, new_steps


# Pure-JAX reference (mirrors the PyTorch module) for verification.
def reference_forward(x, mu, sigma, rho, beta, steps, *, eps=1e-6,
                      momentum=0.002, training=True):
    if training:
        m = x.mean(axis=(0, 1))
        v = jnp.sqrt(x.var(axis=(0, 1), ddof=0))
        mu = (1 - momentum) * mu + momentum * m
        sigma = (1 - momentum) * sigma + momentum * v
        steps = steps + 1
    gamma = jax.nn.sigmoid(rho)
    x_hat = (x - mu) / (sigma + eps)
    return x_hat * gamma + beta, mu, sigma, steps


def _check(x, mu, sigma, rho, beta, steps, *, training):
    out, new_mu, new_sigma, new_steps = batch_affine_norm_forward(
        x, mu, sigma, rho, beta, steps, training=training)
    jax.block_until_ready(out)
    ref_out, ref_mu, ref_sigma, ref_steps = reference_forward(
        x, mu, sigma, rho, beta, steps, training=training)
    assert jnp.allclose(out, ref_out, atol=1e-5, rtol=1e-5), "output mismatch"
    assert jnp.allclose(new_mu, ref_mu, atol=1e-6), "mu mismatch"
    assert jnp.allclose(new_sigma, ref_sigma, atol=1e-6), "sigma mismatch"
    assert int(new_steps) == int(ref_steps), "steps mismatch"


if __name__ == "__main__":
    key = jax.random.PRNGKey(0)

    # Case 1: D divides 128 (lane-fold k=4), training and eval paths.
    B, T, D = 2, 8, 32
    k1, k2 = jax.random.split(key)
    x = jax.random.normal(k1, (B, T, D), dtype=jnp.float32) * 2.0 + 0.5
    mu = jnp.zeros((D,), jnp.float32)
    sigma = jnp.ones((D,), jnp.float32)
    steps = jnp.array(0, dtype=jnp.int32)
    rho = jnp.full((D,), -2.0, jnp.float32)
    beta = jnp.zeros((D,), jnp.float32)
    _check(x, mu, sigma, rho, beta, steps, training=True)
    _check(x, mu, sigma, rho, beta, steps, training=False)

    # Case 2: D does not divide 128 (generalized fold k = 128 // gcd(D,128) = 16).
    B2, T2, D2 = 2, 16, 24
    x2 = jax.random.normal(k2, (B2, T2, D2), dtype=jnp.float32) * 0.7 - 1.3
    mu2 = jnp.zeros((D2,), jnp.float32)
    sigma2 = jnp.ones((D2,), jnp.float32)
    steps2 = jnp.array(3, dtype=jnp.int32)
    rho2 = jnp.full((D2,), -2.0, jnp.float32)
    beta2 = jnp.full((D2,), 0.25, jnp.float32)
    _check(x2, mu2, sigma2, rho2, beta2, steps2, training=True)

    print("KERNEL_OK")
</pallas_src>

<mosaic_0001>
module attributes {stable_mosaic.version = 11 : i64} {
  func.func @_stats_kernel(%arg0: i32, %arg1: i32, %arg2: i32, %arg3: memref<4x128xf32, #tpu.memory_space<vmem>>, %arg4: memref<1x128xf32, #tpu.memory_space<vmem>>, %arg5: memref<8x128xf32, #tpu.memory_space<vmem>>, %arg6: memref<8x128xf32, #tpu.memory_space<vmem>>) attributes {dimension_semantics = [#tpu.dimension_semantics<parallel>, #tpu.dimension_semantics<arbitrary>, #tpu.dimension_semantics<arbitrary>], iteration_bounds = array<i64: 1, 1, 1>, scalar_prefetch = 0 : i64, scratch_operands = 0 : i64, tpu.core_type = #tpu.core_type<tc>, window_params = [{transform_indices = @transform_0, window_bounds = array<i64: 4, 128>}, {transform_indices = @transform_1, window_bounds = array<i64: 1, 128>}, {transform_indices = @transform_2, window_bounds = array<i64: 8, 128>}, {transform_indices = @transform_3, window_bounds = array<i64: 8, 128>}]} {
    %c0_i32 = arith.constant 0 : i32
    %0 = arith.cmpi eq, %arg2, %c0_i32 : i32
    %1 = arith.extui %0 : i1 to i32
    %c0_i32_0 = arith.constant 0 : i32
    %2 = arith.cmpi ne, %1, %c0_i32_0 : i32
    scf.if %2 {
      %cst_13 = arith.constant 0.000000e+00 : f32
      %18 = vector.broadcast %cst_13 : f32 to vector<8x128xf32>
      %c0_14 = arith.constant 0 : index
      %c0_15 = arith.constant 0 : index
      %19 = vector.load %arg5[%c0_14, %c0_15] : memref<8x128xf32, #tpu.memory_space<vmem>>, vector<8x128xf32>
      tpu.vector_store %arg5[%c0_14, %c0_15], %18 {strides = array<i32>} : memref<8x128xf32, #tpu.memory_space<vmem>>, vector<8x128xf32>,
      %cst_16 = arith.constant 0.000000e+00 : f32
      %20 = vector.broadcast %cst_16 : f32 to vector<8x128xf32>
      %c0_17 = arith.constant 0 : index
      %c0_18 = arith.constant 0 : index
      %21 = vector.load %arg6[%c0_17, %c0_18] : memref<8x128xf32, #tpu.memory_space<vmem>>, vector<8x128xf32>
      tpu.vector_store %arg6[%c0_17, %c0_18], %20 {strides = array<i32>} : memref<8x128xf32, #tpu.memory_space<vmem>>, vector<8x128xf32>,
    } else {
    }
    %c0 = arith.constant 0 : index
    %c0_1 = arith.constant 0 : index
    %3 = vector.load %arg3[%c0, %c0_1] : memref<4x128xf32, #tpu.memory_space<vmem>>, vector<4x128xf32>
    %c0_2 = arith.constant 0 : index
    %c0_3 = arith.constant 0 : index
    %4 = vector.load %arg4[%c0_2, %c0_3] : memref<1x128xf32, #tpu.memory_space<vmem>>, vector<1x128xf32>
    %5 = vector.broadcast %4 : vector<1x128xf32> to vector<4x128xf32>
    %6 = arith.subf %3, %5 : vector<4x128xf32>
    %c0_4 = arith.constant 0 : index
    %c0_5 = arith.constant 0 : index
    %7 = vector.load %arg5[%c0_4, %c0_5] : memref<8x128xf32, #tpu.memory_space<vmem>>, vector<1x128xf32>
    %cst = arith.constant dense<0.000000e+00> : vector<128xf32>
    %8 = vector.multi_reduction <add>, %6, %cst [0] : vector<4x128xf32> to vector<128xf32>
    %9 = vector.shape_cast %8 : vector<128xf32> to vector<1x128xf32>
    %10 = arith.addf %7, %9 : vector<1x128xf32>
    %c0_6 = arith.constant 0 : index
    %c0_7 = arith.constant 0 : index
    %11 = vector.load %arg5[%c0_6, %c0_7] : memref<8x128xf32, #tpu.memory_space<vmem>>, vector<1x128xf32>
    tpu.vector_store %arg5[%c0_6, %c0_7], %10 {strides = array<i32>} : memref<8x128xf32, #tpu.memory_space<vmem>>, vector<1x128xf32>,
    %c0_8 = arith.constant 0 : index
    %c0_9 = arith.constant 0 : index
    %12 = vector.load %arg6[%c0_8, %c0_9] : memref<8x128xf32, #tpu.memory_space<vmem>>, vector<1x128xf32>
    %13 = arith.mulf %6, %6 : vector<4x128xf32>
    %cst_10 = arith.constant dense<0.000000e+00> : vector<128xf32>
    %14 = vector.multi_reduction <add>, %13, %cst_10 [0] : vector<4x128xf32> to vector<128xf32>
    %15 = vector.shape_cast %14 : vector<128xf32> to vector<1x128xf32>
    %16 = arith.addf %12, %15 : vector<1x128xf32>
    %c0_11 = arith.constant 0 : index
    %c0_12 = arith.constant 0 : index
    %17 = vector.load %arg6[%c0_11, %c0_12] : memref<8x128xf32, #tpu.memory_space<vmem>>, vector<1x128xf32>
    tpu.vector_store %arg6[%c0_11, %c0_12], %16 {strides = array<i32>} : memref<8x128xf32, #tpu.memory_space<vmem>>, vector<1x128xf32>,
    return
  }
  func.func @transform_0(%arg0: i32, %arg1: i32, %arg2: i32) -> (i32, i32) {
    %c1_i32 = arith.constant 1 : i32
    %0 = arith.muli %arg0, %c1_i32 : i32
    %1 = arith.addi %0, %arg2 : i32
    %c0_i32 = arith.constant 0 : i32
    %2 = arith.minsi %1, %c0_i32 : i32
    %c0_i32_0 = arith.constant 0 : i32
    return %2, %arg1 : i32, i32
  }
  func.func @transform_1(%arg0: i32, %arg1: i32, %arg2: i32) -> (i32, i32) {
    %c0_i32 = arith.constant 0 : i32
    %c0_i32_0 = arith.constant 0 : i32
    return %c0_i32, %arg1 : i32, i32
  }
  func.func @transform_2(%arg0: i32, %arg1: i32, %arg2: i32) -> (i32, i32) {
    %c0_i32 = arith.constant 0 : i32
    return %arg0, %arg1 : i32, i32
  }
  func.func @transform_3(%arg0: i32, %arg1: i32, %arg2: i32) -> (i32, i32) {
    %c0_i32 = arith.constant 0 : i32
    return %arg0, %arg1 : i32, i32
  }
}

</mosaic_0001>

<bundles_post_ra>
// kernel: tpu_custom_call.1
= control target key start
LH: loop header
LB: loop body
LE: loop exit
PB: predicated region body
PF: predicated region fallthrough
CT: control target
= control target key end

     0   :  { %9 = vsyncpa [#allocation3], 0  ;;  %s210_s0 = inlined_call_operand.hbm [shape: f32[4,128], index: 0, kind: input, shape index: {}]   ;;  %s211_s1 = inlined_call_operand.vmem [shape: f32[1,128], index: 1, kind: input, shape index: {}]   ;;  %s212_s2 = inlined_call_operand.hbm [shape: f32[8,128], index: 2, kind: output, shape index: {0}]   ;;  %s213_s3 = inlined_call_operand.hbm [shape: f32[8,128], index: 3, kind: output, shape index: {1}]  }
   0x1   :  { %10 = vsyncpa [#allocation4], 0 }
   0x2   :  { %11 = vsyncpa [#allocation7], 0  ;;  %s174_s12 = smov [#allocation2]  }
   0x3   :  { %s23_s13 = sshll.u32 %s174_s12, 4  ;;  %s24_s13 = int_to_ptr.vmem [resolvable:$true] %s23_s13 }
   0x4   :  { %s116_s14 = scalar_lea.vmem %s24_s13, 64  ;;  %p121_p1 = scmp.lt.s32.totalorder %s24_s13, %s24_s13 }
   0x5   :  { %p117_p0 = scmp.ne.s32.totalorder %s24_s13, %s116_s14  ;;  %p122_p2 = scmp.lt.s32.totalorder %s116_s14, %s116_s14 }
   0x7   :  { %p123_p3 = por %p122_p2, %p121_p1 }
   0x9   :  { %p124_p4 = pnand %p123_p3, %p117_p0 }
   0xb   :  { %127 = shalt.err (!%p124_p4)
}
   0xc   :  { %26 = dma.hbm_to_vmem [thread:$0]  %s210_s0, 64, %s24_s13, [#allocation3]  }
   0xd   :  { %168 = dma.done.wait [#allocation3], 64  }
   0xe   :  { %169 = vsyncadd [#allocation3], 4294967232  ;;  %v175_v0 = vmov 0.0   ;;  %v41_v1 = vld [vmem:[#allocation2] sm:$0xf]  ;;  %vm51_vm0 = vcmask 1043456  }
   0xf   :  { %39 = vst [vmem:[#allocation5] sm:$0xff] %v175_v0  ;;  %40 = vst [vmem:[#allocation6] sm:$0xff] %v175_v0  ;;  %v103_v2 = vld [vmem:[%s211_s1] ss:$0 sm:$0xff]  ;;  %s176_s0 = smov [#allocation5]   ;;  %s177_s1 = smov [#allocation6]  }
  0x10   :  { %v49_v3 = vsub.f32 %v41_v1, %v103_v2  ;;  %s78_s19 = sshll.u32 %s176_s0, 4  ;;  %s88_s20 = sshll.u32 %s177_s1, 4  ;;  %s79_s19 = int_to_ptr.vmem [resolvable:$true] %s78_s19  ;;  %s89_s20 = int_to_ptr.vmem [resolvable:$true] %s88_s20 }
  0x11   :  { %s128_s21 = scalar_lea.vmem %s79_s19, 128  ;;  %p133_p6 = scmp.lt.s32.totalorder %s79_s19, %s79_s19 }
  0x12   :  { %v52_v4 = vsel %vm51_vm0, %v49_v3, 0.0  ;;  %v62_v5 = vmul.f32 %v49_v3, %v49_v3  ;;  %p129_p5 = scmp.ne.s32.totalorder %s79_s19, %s128_s21  ;;  %p134_p7 = scmp.lt.s32.totalorder %s128_s21, %s128_s21 }
  0x13   :  { %v53_v6 = vrot.slane %v52_v4, 4 }
  0x14   :  { %v63_v7 = vsel %vm51_vm0, %v62_v5, 0.0  ;;  %p135_p8 = por %p134_p7, %p133_p6 }
  0x15   :  { %v54_v8 = vadd.f32 %v53_v6, %v52_v4  ;;  %v64_v9 = vrot.slane %v63_v7, 4 }
  0x16   :  { %v50_v16 = vld [vmem:[#allocation5] sm:$0x1]  ;;  %v61_v19 = vld [vmem:[#allocation6] sm:$0x1]  ;;  %p136_p9 = pnand %p135_p8, %p129_p5 }
  0x17   :  { %v55_v10 = vrot.slane %v54_v8, 2  ;;  %v65_v11 = vadd.f32 %v64_v9, %v63_v7 }
  0x19   :  { %v56_v12 = vadd.f32 %v55_v10, %v54_v8  ;;  %v66_v13 = vrot.slane %v65_v11, 2 }
  0x1b   :  { %v57_v14 = vrot.slane %v56_v12, 1  ;;  %v67_v15 = vadd.f32 %v66_v13, %v65_v11 }
  0x1d   :  { %v58_v17 = vadd.f32 %v57_v14, %v56_v12  ;;  %v68_v18 = vrot.slane %v67_v15, 1 }
  0x1f   :  { %v59_v20 = vadd.f32 %v58_v17, %v50_v16  ;;  %v69_v21 = vadd.f32 %v68_v18, %v67_v15 }
  0x21   :  { %60 = vst [vmem:[#allocation5] sm:$0x1] %v59_v20  ;;  %v70_v22 = vadd.f32 %v69_v21, %v61_v19 }
  0x22   :  { %139 = shalt.err (!%p136_p9)
}
  0x23   :  { %81 = dma.vmem_to_hbm [thread:$0]  %s79_s19, 128, %s212_s2, [#allocation4]   ;;  %71 = vst [vmem:[#allocation6] sm:$0x1] %v70_v22 }
  0x24   :  { %s148_s24 = scalar_lea.vmem %s89_s20, 128  ;;  %p153_p11 = scmp.lt.s32.totalorder %s89_s20, %s89_s20 }
  0x25   :  { %p149_p10 = scmp.ne.s32.totalorder %s89_s20, %s148_s24  ;;  %p154_p12 = scmp.lt.s32.totalorder %s148_s24, %s148_s24 }
  0x27   :  { %p155_p13 = por %p154_p12, %p153_p11 }
  0x29   :  { %p156_p0 = pnand %p155_p13, %p149_p10 }
  0x2b   :  { %159 = shalt.err (!%p156_p0)
}
  0x2c   :  { %91 = dma.vmem_to_hbm [thread:$0]  %s89_s20, 128, %s213_s3, [#allocation7]  }
  0x2d   :  { %170 = dma.done.wait [#allocation4], 128  }
  0x2e   :  { %171 = vsyncadd [#allocation4], 4294967168 }
  0x2f   :  { %172 = dma.done.wait [#allocation7], 128  }
  0x30   :  { %173 = vsyncadd [#allocation7], 4294967168 }
  0x31   :  { %98 = vsyncpa [#allocation3], 1 }
  0x32   :  { %99 = vsyncpa [#allocation4], 1 }
  0x33   :  { %100 = vsyncpa [#allocation7], 1 }

</bundles_post_ra>
